<compile_context>
chip_gen: v7x
topology: tpu7x:2x2x1
jax: 0.10.0
libtpu: 0.0.40
codegen_flags: <defaults>
</compile_context>

<pallas_src>
import math

import jax
import jax.numpy as jnp
from jax import lax
from jax.experimental import pallas as pl
from jax.experimental.pallas import tpu as pltpu

NUM_CLASSES = 19
GAMMA = 0.0
EPS = 1e-07
IGNORE_INDEX = 255


def _make_focal_kernel(hw, tile, gamma, eps, ignore_index):
    log_eps = math.log(eps)
    log_1m_eps = math.log1p(-eps)

    def kernel(x_ref, t_ref, loss_ref, cnt_ref, acc_ref, cnt_acc_ref):
        b = pl.program_id(0)
        j = pl.program_id(1)
        nb = pl.num_programs(0)
        nj = pl.num_programs(1)

        @pl.when(jnp.logical_and(b == 0, j == 0))
        def _():
            acc_ref[...] = jnp.zeros_like(acc_ref)
            cnt_acc_ref[...] = jnp.zeros_like(cnt_acc_ref)

        x = x_ref[0].astype(jnp.float32)   # (C, tile): classes on sublanes, pixels on lanes
        t = t_ref[0]                       # (1, tile) int32 labels

        # log-softmax over the class axis (axis 0) evaluated at the target class
        m = jnp.max(x, axis=0, keepdims=True)                      # (1, tile)
        denom = jnp.sum(jnp.exp(x - m), axis=0, keepdims=True)     # (1, tile)
        classes = lax.broadcasted_iota(jnp.int32, x.shape, 0)      # (C, tile)
        x_t = jnp.sum(jnp.where(classes == t, x, 0.0),
                      axis=0, keepdims=True)                       # (1, tile)
        log_p = (x_t - m) - jnp.log(denom)
        # clip(p, eps, 1-eps)  <=>  clip(log p, log eps, log(1-eps))
        log_p = jnp.clip(log_p, log_eps, log_1m_eps)

        if gamma != 0.0:
            p = jnp.exp(log_p)
            batch_loss = -jnp.power(1.0 - p, gamma) * log_p
        else:
            # pow(1-p, 0) == 1 exactly (p is clipped away from 1), so drop it.
            batch_loss = -log_p                                    # (1, tile)

        # valid = not ignore_index AND inside the real H*W extent (tail tile).
        lane = lax.broadcasted_iota(jnp.int32, (1, tile), 1)
        in_bounds = (j * tile + lane) < hw
        valid = jnp.logical_and(t != ignore_index, in_bounds)

        # per-lane partial sums (cheap VPU adds); where() so OOB NaNs never mix in
        acc_ref[...] += jnp.where(valid, batch_loss, 0.0)
        cnt_acc_ref[...] += jnp.where(valid, 1.0, 0.0)

        # single cross-lane reduce + (1,1) store at the very last grid step
        @pl.when(jnp.logical_and(b == nb - 1, j == nj - 1))
        def _():
            loss_ref[...] = jnp.sum(acc_ref[...]).reshape(1, 1)
            cnt_ref[...] = jnp.sum(cnt_acc_ref[...]).reshape(1, 1)

    return kernel


def focal_loss(logits_nchw, target_nhw, *, tile_hw=4096):
    """logits_nchw: (B, C, H, W) float (f32 or bf16); target_nhw: (B, H, W) int."""
    B, C, H, W = logits_nchw.shape
    HW = H * W

    # NCHW consumed directly: contiguous reshape only (no HBM transpose pass).
    x = logits_nchw.reshape(B, C, HW)
    t = target_nhw.reshape(B, 1, HW).astype(jnp.int32)

    if HW <= tile_hw:
        tile = HW                                   # block == full dim: always legal
    else:
        tile = max(128, (tile_hw // 128) * 128)     # lane block must be multiple of 128
    n_j = pl.cdiv(HW, tile)

    kernel = _make_focal_kernel(HW, tile, GAMMA, EPS, IGNORE_INDEX)

    cost = pl.CostEstimate(
        flops=6 * B * HW * C,
        transcendentals=B * HW * (C + 1),
        bytes_accessed=B * HW * (C * x.dtype.itemsize + 4) + 8,
    )

    # NOTE: both grid axes are "arbitrary" because the shared scratch
    # accumulator / single (1,1) output block carries across the whole grid.
    # (A v7x 2-TC split would need per-core partial outputs summed in the
    # wrapper; kept single-stream here for correctness/simplicity.)
    loss_sum, cnt = pl.pallas_call(
        kernel,
        out_shape=(
            jax.ShapeDtypeStruct((1, 1), jnp.float32),
            jax.ShapeDtypeStruct((1, 1), jnp.float32),
        ),
        grid_spec=pltpu.PrefetchScalarGridSpec(
            num_scalar_prefetch=0,
            grid=(B, n_j),
            in_specs=[
                pl.BlockSpec((1, C, tile), lambda b, j: (b, 0, j)),
                pl.BlockSpec((1, 1, tile), lambda b, j: (b, 0, j)),
            ],
            out_specs=(
                pl.BlockSpec((1, 1), lambda b, j: (0, 0)),
                pl.BlockSpec((1, 1), lambda b, j: (0, 0)),
            ),
            scratch_shapes=[
                pltpu.VMEM((1, tile), jnp.float32),   # per-lane loss partials
                pltpu.VMEM((1, tile), jnp.float32),   # per-lane valid counts
            ],
        ),
        compiler_params=pltpu.CompilerParams(
            dimension_semantics=("arbitrary", "arbitrary")),
        cost_estimate=cost,
    )(x, t)

    # size_average=True -> mean over valid elements (NaN if zero valid, same as ref)
    return (loss_sum / cnt)[0, 0]


def _reference(logits_nchw, target_nhw):
    B, C, H, W = logits_nchw.shape
    x = jnp.transpose(logits_nchw, (0, 2, 3, 1)).reshape(-1, C).astype(jnp.float32)
    t = target_nhw.reshape(-1)
    valid = t != IGNORE_INDEX
    probs = jax.nn.softmax(x, axis=1)
    onehot = jax.nn.one_hot(t, C, dtype=probs.dtype)
    p = jnp.clip(jnp.sum(probs * onehot, axis=1), EPS, 1.0 - EPS)
    bl = -jnp.power(1.0 - p, GAMMA) * jnp.log(p)
    return jnp.sum(bl * valid) / jnp.sum(valid)


if __name__ == "__main__":
    key = jax.random.PRNGKey(0)
    k1, k2, k3 = jax.random.split(key, 3)

    B, C, H, W = 2, NUM_CLASSES, 16, 16
    logits = jax.random.normal(k1, (B, C, H, W), dtype=jnp.float32)
    target = jax.random.randint(k2, (B, H, W), 0, C, dtype=jnp.int32)
    # sprinkle some ignore_index labels
    ign_mask = jax.random.uniform(k3, (B, H, W)) < 0.1
    target = jnp.where(ign_mask, IGNORE_INDEX, target)

    loss = focal_loss(logits, target)
    jax.block_until_ready(loss)

    ref = _reference(logits, target)
    assert jnp.allclose(loss, ref, rtol=1e-5, atol=1e-6), (loss, ref)

    print("KERNEL_OK")
</pallas_src>

<mosaic_0001>
module attributes {stable_mosaic.version = 11 : i64} {
  func.func @kernel(%arg0: i32, %arg1: i32, %arg2: memref<1x19x256xf32, #tpu.memory_space<vmem>>, %arg3: memref<1x1x256xi32, #tpu.memory_space<vmem>>, %arg4: memref<1x1xf32, #tpu.memory_space<vmem>>, %arg5: memref<1x1xf32, #tpu.memory_space<vmem>>, %arg6: memref<1x256xf32, #tpu.memory_space<vmem>>, %arg7: memref<1x256xf32, #tpu.memory_space<vmem>>) attributes {dimension_semantics = [#tpu.dimension_semantics<arbitrary>, #tpu.dimension_semantics<arbitrary>], iteration_bounds = array<i64: 2, 1>, scalar_prefetch = 0 : i64, scratch_operands = 2 : i64, tpu.core_type = #tpu.core_type<tc>, window_params = [{transform_indices = @transform_0, window_bounds = array<i64: 1, 19, 256>}, {transform_indices = @transform_1, window_bounds = array<i64: 1, 1, 256>}, {pipeline_mode = #tpu.pipeline_mode<synchronous>, transform_indices = @transform_2, window_bounds = array<i64: 1, 1>}, {pipeline_mode = #tpu.pipeline_mode<synchronous>, transform_indices = @transform_3, window_bounds = array<i64: 1, 1>}]} {
    %c0_i32 = arith.constant 0 : i32
    %0 = arith.cmpi eq, %arg0, %c0_i32 : i32
    %c0_i32_0 = arith.constant 0 : i32
    %1 = arith.cmpi eq, %arg1, %c0_i32_0 : i32
    %2 = arith.andi %0, %1 : i1
    %3 = arith.extui %2 : i1 to i32
    %c0_i32_1 = arith.constant 0 : i32
    %4 = arith.cmpi ne, %3, %c0_i32_1 : i32
    scf.if %4 {
      %cst_27 = arith.constant 0.000000e+00 : f32
      %57 = vector.broadcast %cst_27 : f32 to vector<1x256xf32>
      %c0_28 = arith.constant 0 : index
      %c0_29 = arith.constant 0 : index
      %58 = vector.load %arg6[%c0_28, %c0_29] : memref<1x256xf32, #tpu.memory_space<vmem>>, vector<1x256xf32>
      tpu.vector_store %arg6[%c0_28, %c0_29], %57 {strides = array<i32>} : memref<1x256xf32, #tpu.memory_space<vmem>>, vector<1x256xf32>,
      %cst_30 = arith.constant 0.000000e+00 : f32
      %59 = vector.broadcast %cst_30 : f32 to vector<1x256xf32>
      %c0_31 = arith.constant 0 : index
      %c0_32 = arith.constant 0 : index
      %60 = vector.load %arg7[%c0_31, %c0_32] : memref<1x256xf32, #tpu.memory_space<vmem>>, vector<1x256xf32>
      tpu.vector_store %arg7[%c0_31, %c0_32], %59 {strides = array<i32>} : memref<1x256xf32, #tpu.memory_space<vmem>>, vector<1x256xf32>,
    } else {
    }
    %c0 = arith.constant 0 : index
    %c0_2 = arith.constant 0 : index
    %c0_3 = arith.constant 0 : index
    %5 = vector.load %arg2[%c0, %c0_2, %c0_3] : memref<1x19x256xf32, #tpu.memory_space<vmem>>, vector<1x19x256xf32>
    %6 = vector.shape_cast %5 : vector<1x19x256xf32> to vector<19x256xf32>
    %c0_4 = arith.constant 0 : index
    %c0_5 = arith.constant 0 : index
    %c0_6 = arith.constant 0 : index
    %7 = vector.load %arg3[%c0_4, %c0_5, %c0_6] : memref<1x1x256xi32, #tpu.memory_space<vmem>>, vector<1x1x256xi32>
    %8 = vector.shape_cast %7 : vector<1x1x256xi32> to vector<1x256xi32>
    %cst = arith.constant dense<0xFF800000> : vector<256xf32>
    %9 = vector.multi_reduction <maximumf>, %6, %cst [0] : vector<19x256xf32> to vector<256xf32>
    %10 = vector.shape_cast %9 : vector<256xf32> to vector<1x256xf32>
    %11 = vector.broadcast %10 : vector<1x256xf32> to vector<19x256xf32>
    %12 = arith.subf %6, %11 : vector<19x256xf32>
    %13 = math.exp %12 : vector<19x256xf32>
    %cst_7 = arith.constant dense<0.000000e+00> : vector<256xf32>
    %14 = vector.multi_reduction <add>, %13, %cst_7 [0] : vector<19x256xf32> to vector<256xf32>
    %15 = vector.shape_cast %14 : vector<256xf32> to vector<1x256xf32>
    %16 = tpu.iota {dimensions = array<i32: 0>} : vector<19x256xi32>
    %17 = vector.broadcast %8 : vector<1x256xi32> to vector<19x256xi32>
    %18 = arith.cmpi eq, %16, %17 : vector<19x256xi32>
    %cst_8 = arith.constant 0.000000e+00 : f32
    %19 = vector.broadcast %cst_8 : f32 to vector<19x256xf32>
    %20 = arith.select %18, %6, %19 : vector<19x256xi1>, vector<19x256xf32>
    %cst_9 = arith.constant dense<0.000000e+00> : vector<256xf32>
    %21 = vector.multi_reduction <add>, %20, %cst_9 [0] : vector<19x256xf32> to vector<256xf32>
    %22 = vector.shape_cast %21 : vector<256xf32> to vector<1x256xf32>
    %23 = arith.subf %22, %10 : vector<1x256xf32>
    %24 = math.log %15 : vector<1x256xf32>
    %25 = arith.subf %23, %24 : vector<1x256xf32>
    %cst_10 = arith.constant -16.1180954 : f32
    %cst_11 = arith.constant -1.00000008E-7 : f32
    %26 = vector.broadcast %cst_10 : f32 to vector<1x256xf32>
    %27 = arith.maximumf %26, %25 : vector<1x256xf32>
    %28 = vector.broadcast %cst_11 : f32 to vector<1x256xf32>
    %29 = arith.minimumf %28, %27 : vector<1x256xf32>
    %cst_12 = arith.constant 0.000000e+00 : f32
    %30 = vector.broadcast %cst_12 : f32 to vector<1x256xf32>
    %31 = arith.subf %30, %29 : vector<1x256xf32>
    %32 = tpu.iota {dimensions = array<i32: 1>} : vector<1x256xi32>
    %c256_i32 = arith.constant 256 : i32
    %33 = arith.muli %arg1, %c256_i32 : i32
    %34 = vector.broadcast %33 : i32 to vector<1x256xi32>
    %35 = arith.addi %34, %32 : vector<1x256xi32>
    %c256_i32_13 = arith.constant 256 : i32
    %36 = vector.broadcast %c256_i32_13 : i32 to vector<1x256xi32>
    %37 = arith.cmpi slt, %35, %36 : vector<1x256xi32>
    %c255_i32 = arith.constant 255 : i32
    %38 = vector.broadcast %c255_i32 : i32 to vector<1x256xi32>
    %39 = arith.cmpi ne, %8, %38 : vector<1x256xi32>
    %40 = arith.andi %39, %37 : vector<1x256xi1>
    %c0_14 = arith.constant 0 : index
    %c0_15 = arith.constant 0 : index
    %41 = vector.load %arg6[%c0_14, %c0_15] : memref<1x256xf32, #tpu.memory_space<vmem>>, vector<1x256xf32>
    %cst_16 = arith.constant 0.000000e+00 : f32
    %42 = vector.broadcast %cst_16 : f32 to vector<1x256xf32>
    %43 = arith.select %40, %31, %42 : vector<1x256xi1>, vector<1x256xf32>
    %44 = arith.addf %41, %43 : vector<1x256xf32>
    %c0_17 = arith.constant 0 : index
    %c0_18 = arith.constant 0 : index
    %45 = vector.load %arg6[%c0_17, %c0_18] : memref<1x256xf32, #tpu.memory_space<vmem>>, vector<1x256xf32>
    tpu.vector_store %arg6[%c0_17, %c0_18], %44 {strides = array<i32>} : memref<1x256xf32, #tpu.memory_space<vmem>>, vector<1x256xf32>,
    %c0_19 = arith.constant 0 : index
    %c0_20 = arith.constant 0 : index
    %46 = vector.load %arg7[%c0_19, %c0_20] : memref<1x256xf32, #tpu.memory_space<vmem>>, vector<1x256xf32>
    %cst_21 = arith.constant 1.000000e+00 : f32
    %cst_22 = arith.constant 0.000000e+00 : f32
    %47 = vector.broadcast %cst_21 : f32 to vector<1x256xf32>
    %48 = vector.broadcast %cst_22 : f32 to vector<1x256xf32>
    %49 = arith.select %40, %47, %48 : vector<1x256xi1>, vector<1x256xf32>
    %50 = arith.addf %46, %49 : vector<1x256xf32>
    %c0_23 = arith.constant 0 : index
    %c0_24 = arith.constant 0 : index
    %51 = vector.load %arg7[%c0_23, %c0_24] : memref<1x256xf32, #tpu.memory_space<vmem>>, vector<1x256xf32>
    tpu.vector_store %arg7[%c0_23, %c0_24], %50 {strides = array<i32>} : memref<1x256xf32, #tpu.memory_space<vmem>>, vector<1x256xf32>,
    %c1_i32 = arith.constant 1 : i32
    %52 = arith.cmpi eq, %arg0, %c1_i32 : i32
    %c0_i32_25 = arith.constant 0 : i32
    %53 = arith.cmpi eq, %arg1, %c0_i32_25 : i32
    %54 = arith.andi %52, %53 : i1
    %55 = arith.extui %54 : i1 to i32
    %c0_i32_26 = arith.constant 0 : i32
    %56 = arith.cmpi ne, %55, %c0_i32_26 : i32
    scf.if %56 {
      %c0_27 = arith.constant 0 : index
      %c0_28 = arith.constant 0 : index
      %57 = vector.load %arg6[%c0_27, %c0_28] : memref<1x256xf32, #tpu.memory_space<vmem>>, vector<1x256xf32>
      %58 = vector.shape_cast %57 : vector<1x256xf32> to vector<1x1x256xf32>
      %cst_29 = arith.constant dense<0.000000e+00> : vector<1xf32>
      %59 = vector.multi_reduction <add>, %58, %cst_29 [1, 2] : vector<1x1x256xf32> to vector<1xf32>
      %60 = vector.shape_cast %59 : vector<1xf32> to vector<1x1x1xf32>
      %61 = vector.extract %60[0, 0, 0] : f32 from vector<1x1x1xf32>
      %62 = vector.broadcast %61 : f32 to vector<1x1xf32>
      %c0_30 = arith.constant 0 : index
      %c0_31 = arith.constant 0 : index
      %63 = vector.load %arg4[%c0_30, %c0_31] : memref<1x1xf32, #tpu.memory_space<vmem>>, vector<1x1xf32>
      tpu.vector_store %arg4[%c0_30, %c0_31], %62 {strides = array<i32>} : memref<1x1xf32, #tpu.memory_space<vmem>>, vector<1x1xf32>,
      %c0_32 = arith.constant 0 : index
      %c0_33 = arith.constant 0 : index
      %64 = vector.load %arg7[%c0_32, %c0_33] : memref<1x256xf32, #tpu.memory_space<vmem>>, vector<1x256xf32>
      %65 = vector.shape_cast %64 : vector<1x256xf32> to vector<1x1x256xf32>
      %cst_34 = arith.constant dense<0.000000e+00> : vector<1xf32>
      %66 = vector.multi_reduction <add>, %65, %cst_34 [1, 2] : vector<1x1x256xf32> to vector<1xf32>
      %67 = vector.shape_cast %66 : vector<1xf32> to vector<1x1x1xf32>
      %68 = vector.extract %67[0, 0, 0] : f32 from vector<1x1x1xf32>
      %69 = vector.broadcast %68 : f32 to vector<1x1xf32>
      %c0_35 = arith.constant 0 : index
      %c0_36 = arith.constant 0 : index
      %70 = vector.load %arg5[%c0_35, %c0_36] : memref<1x1xf32, #tpu.memory_space<vmem>>, vector<1x1xf32>
      tpu.vector_store %arg5[%c0_35, %c0_36], %69 {strides = array<i32>} : memref<1x1xf32, #tpu.memory_space<vmem>>, vector<1x1xf32>,
    } else {
    }
    return
  }
  func.func @transform_0(%arg0: i32, %arg1: i32) -> (i32, i32, i32) {
    %c0_i32 = arith.constant 0 : i32
    %c0_i32_0 = arith.constant 0 : i32
    return %arg0, %c0_i32, %arg1 : i32, i32, i32
  }
  func.func @transform_1(%arg0: i32, %arg1: i32) -> (i32, i32, i32) {
    %c0_i32 = arith.constant 0 : i32
    %c0_i32_0 = arith.constant 0 : i32
    return %arg0, %c0_i32, %arg1 : i32, i32, i32
  }
  func.func @transform_2(%arg0: i32, %arg1: i32) -> (i32, i32) {
    %c0_i32 = arith.constant 0 : i32
    %c0_i32_0 = arith.constant 0 : i32
    %c0_i32_1 = arith.constant 0 : i32
    return %c0_i32, %c0_i32_0 : i32, i32
  }
  func.func @transform_3(%arg0: i32, %arg1: i32) -> (i32, i32) {
    %c0_i32 = arith.constant 0 : i32
    %c0_i32_0 = arith.constant 0 : i32
    %c0_i32_1 = arith.constant 0 : i32
    return %c0_i32, %c0_i32_0 : i32, i32
  }
}

</mosaic_0001>

<bundles_post_ra>
// kernel: tpu_custom_call.1
= control target key start
LH: loop header
LB: loop body
LE: loop exit
PB: predicated region body
PF: predicated region fallthrough
CT: control target
= control target key end

     0   :  { %9 = vsyncpa [#allocation5], 0  ;;  %s937_s0 = inlined_call_operand.vmem [shape: f32[2,19,256], index: 0, kind: input, shape index: {}]   ;;  %s938_s1 = inlined_call_operand.vmem [shape: s32[2,1,256], index: 1, kind: input, shape index: {}]   ;;  %s939_s2 = inlined_call_operand.hbm [shape: f32[1,1], index: 2, kind: output, shape index: {0}]   ;;  %s940_s3 = inlined_call_operand.hbm [shape: f32[1,1], index: 3, kind: output, shape index: {1}]  }
   0x1   :  { %10 = vsyncpa [#allocation7], 0  ;;  %s752_s12 = smov 0   ;;  %s754_s13 = smov 0  }
   0x2   :  { %s756_s14 = smov 0  }
   0x3 LB: > { %s563_s15 = sadd.s32 4294967295, %s724_s14   ;;  %s28_s16 = sadd.s32 1, %s720_s13  ;;  %s724_s14 = sphi %s756_s14, %s16_s14   ;;  %s720_s13 = sphi %s754_s13, %s947_s13   ;;  %s716_s12 = sphi %s752_s12, %s946_s12  }
   0x4   : > { %p30_p0 = scmp.ge.s32.totalorder %s28_s16, 2  ;;  %p566_p1 = scmp.ge.s32.totalorder %s724_s14, 1 }
   0x5   : > { %p167_p2 = scmp.lt.s32.totalorder %s724_s14, 3 }
   0x6   : > { %s949_s16 = smov (%p30_p0, %s28_s16), 0 }
   0x7   : > { %p168_p3 = pnand %p566_p1, %p167_p2 }
   0x8   : > { %p199_p4 = scmp.lt.s32.totalorder (!%p168_p3), %s716_s12, 1  ;;  %p217_p5 = scmp.eq.s32.totalorder (!%p168_p3), %s716_s12, 0 }
   0x9   : > { %171 = sbr.rel (%p168_p3) target bundleno = 379 (0x17b), region = 28 }
  0x10   : > { %s200_s17 = scalar_select %p199_p4, %s716_s12, 1 }
  0x11   : > { %222 = sbr.rel (!%p217_p5) target bundleno = 24 (0x18), region = 32  ;;  %v223_v0 = vlaneseq (%p217_p5)  ;;  %v726_v1 = vmov (%p217_p5), 0.0  }
  0x12   : > { %s579_s18 = smul.u32 48, %s200_s17  ;;  %s568_s19 = sshll.u32 %s200_s17, 1 }
  0x13   : > { %s779_s22 = scalar_lea.vmem %s938_s1, %s568_s19  ;;  %vm225_vm0 = vcmp.lt.s32.totalorder (%p217_p5), %v223_v0, 256 }
  0x14   : > { %s206_s25 = scalar_lea.vmem %s937_s0, %s579_s18  ;;  %227 = vst.msk [vmem:[#allocation2] sm:$0x3] (%p217_p5), %vm225_vm0, %v726_v1  ;;  %228 = vst.msk [vmem:[#allocation3] sm:$0x3] (%p217_p5), %vm225_vm0, %v726_v1 }
  0x18 PF: > { %v784_v2 = vld [vmem:[%s206_s25] sm:$0xff]  ;;  %v786_v3 = vld [vmem:[%s206_s25 + $0x8] sm:$0xff]  ;;  %vm236_vm1 = vcmask 1042432   ;;  %p406_p6 = scmp.eq.s32.totalorder %s716_s12, 1  ;;  %v793_v6 = vld [vmem:[%s206_s25 + $0x10] sm:$0xff]  ;;  %v291_v16 = vlaneseq  ;;  %v728_v25 = vmov 1  }
  0x19   : > { %v788_v4 = vld [vmem:[%s206_s25 + $0x20] sm:$0x7]  ;;  %v790_v5 = vld [vmem:[%s206_s25 + $0x28] sm:$0x7]  ;;  %v795_v7 = vld [vmem:[%s206_s25 + $0x18] sm:$0xff]  ;;  %v359_v26 = vcombine.low %v728_v25, %v728_v25  ;;  %v729_v58 = vmov 0.0  }
  0x1a   : > { %v237_v8 = vsel %vm236_vm1, %v788_v4, -inf  ;;  %v246_v9 = vsel %vm236_vm1, %v790_v5, -inf  ;;  %v727_v14 = vmov 1966171168   ;;  %v292_v22 = vshrl.u32 %v291_v16, 7 }
  0x1b   : > { %v238_v10 = vmax.f32 %v784_v2, %v237_v8  ;;  %v247_v11 = vmax.f32 %v786_v3, %v246_v9  ;;  %v361_v15 = vunpack.c.l.s4 %v727_v14  ;;  %v235_v31 = vld [vmem:[%s779_s22] sm:$0x3]  ;;  %vm832_vm3 = vcmp.lt.s32.totalorder %v291_v16, 256  ;;  %v402_v55 = vld [vmem:[#allocation3] sm:$0x3] }
  0x1c   : > { %v807_v30 = vsub.s32 0, %v292_v22  ;;  %v811_v35 = vsub.s32 1, %v292_v22  ;;  %v293_v38 = vadd.s32 8, %v292_v22  ;;  %vm356_vm2 = vcmp.ne.s32.totalorder %v235_v31, 255 }
  0x1d   : > { %v239_v12 = vmax.f32 %v238_v10, %v793_v6  ;;  %v248_v13 = vmax.f32 %v247_v11, %v795_v7  ;;  %v362_v21 = vunpack.c.0.s8 %v361_v15  ;;  %v294_v47 = vadd.s32 16, %v292_v22 }
  0x1e   : > { %v298_v39 = vrot.slane %v235_v31, %v807_v30  ;;  %v302_v48 = vrot.slane %v235_v31, %v811_v35  ;;  %vm423_vm12 = vcmask (%p406_p6), 1040384   ;;  %vm437_vm13 = vcmask (%p406_p6), 0  }
  0x1f   : > { %v240_v17 = vrot.slane %v239_v12, 4  ;;  %v249_v18 = vrot.slane %v248_v13, 4  ;;  %v805_v29 = vsub.s32 %v362_v21, %v292_v22 }
  0x20   : > { %vm303_vm4 = vcmp.eq.s32.totalorder %v292_v22, %v298_v39  ;;  %vm304_vm6 = vcmp.eq.s32.totalorder %v292_v22, %v302_v48  ;;  %vm305_vm7 = vcmp.eq.s32.totalorder %v293_v38, %v298_v39  ;;  %vm306_vm9 = vcmp.eq.s32.totalorder %v293_v38, %v302_v48 }
  0x21   : > { %v241_v19 = vmax.f32 %v239_v12, %v240_v17  ;;  %v250_v20 = vmax.f32 %v248_v13, %v249_v18  ;;  %v366_v34 = vrot.slane %v359_v26, %v805_v29  ;;  %vm307_vm10 = vcmp.eq.s32.totalorder %v294_v47, %v298_v39 }
  0x22   : > { %vm308_vm11 = vcmp.eq.s32.totalorder %v294_v47, %v302_v48  ;;  %v309_v61 = vsel %vm303_vm4, %v784_v2, 0.0  ;;  %v311_v62 = vsel %vm305_vm7, %v793_v6, 0.0  ;;  %v310_v63 = vsel %vm304_vm6, %v786_v3, 0.0 }
  0x23   : > { %v242_v23 = vrot.slane %v241_v19, 2  ;;  %v251_v24 = vrot.slane %v250_v20, 2  ;;  %v373_v40 = vrot.slane %v366_v34, %v805_v29  ;;  %v312_v0 = vsel %vm306_vm9, %v795_v7, 0.0 }
  0x24   : > { %v313_v1 = vsel %vm307_vm10, %v788_v4, 0.0  ;;  %v314_v8 = vsel %vm308_vm11, %v790_v5, 0.0  ;;  %v315_v9 = vadd.f32 %v311_v62, %v309_v61  ;;  %v324_v11 = vadd.f32 %v312_v0, %v310_v63 }
  0x25   : > { %v243_v27 = vmax.f32 %v241_v19, %v242_v23  ;;  %v252_v28 = vmax.f32 %v250_v20, %v251_v24  ;;  %vm374_vm5 = vcmp.ne.s32.totalorder %v373_v40, 0  ;;  %v316_v10 = vsel %vm236_vm1, %v313_v1, 0.0 }
  0x26   : > { %vm837_vm8 = vmand %vm356_vm2, %vm374_vm5  ;;  %v317_v13 = vadd.f32 %v316_v10, %v315_v9  ;;  %v376_v10 = vld [vmem:[#allocation2] sm:$0x3] }
  0x27   : > { %v244_v32 = vrot.slane %v243_v27, 1  ;;  %v253_v33 = vrot.slane %v252_v28, 1  ;;  %v403_v59 = vsel %vm837_vm8, 1.0, %v729_v58 }
  0x28   : > { %v404_v60 = vadd.f32 %v403_v59, %v402_v55  ;;  %v318_v19 = vrot.slane %v317_v13, 4 }
  0x29   : > { %v813_v36 = vmax.f32 %v243_v27, %v244_v32  ;;  %v815_v37 = vmax.f32 %v252_v28, %v253_v33 }
  0x2a   : > { %405 = vst.msk [vmem:[#allocation3] sm:$0x3] %vm832_vm3, %v404_v60  ;;  %v319_v25 = vadd.f32 %v318_v19, %v317_v13 }
  0x2b   : > { %v255_v41 = vsub.f32 %v784_v2, %v813_v36  ;;  %v256_v42 = vsub.f32 %v786_v3, %v815_v37  ;;  %v257_v43 = vsub.f32 %v793_v6, %v813_v36  ;;  %v258_v44 = vsub.f32 %v795_v7, %v815_v37 }
  0x2c   : > { %v259_v45 = vsub.f32 %v788_v4, %v813_v36  ;;  %v260_v46 = vsub.f32 %v790_v5, %v815_v37  ;;  %v325_v2 = vsel %vm236_vm1, %v314_v8, 0.0  ;;  %v320_v33 = vrot.slane %v319_v25, 2 }
  0x2d   : > { %v261_v49 = vmul.f32 1.442695, %v255_v41  ;;  %v263_v50 = vmul.f32 1.442695, %v256_v42  ;;  %v265_v51 = vmul.f32 1.442695, %v257_v43  ;;  %v326_v3 = vadd.f32 %v325_v2, %v324_v11 }
  0x2e   : > { %v267_v52 = vmul.f32 1.442695, %v258_v44  ;;  %v269_v54 = vmul.f32 1.442695, %v259_v45  ;;  %v271_v56 = vmul.f32 1.442695, %v260_v46  ;;  %v321_v42 = vadd.f32 %v320_v33, %v319_v25 }
  0x2f   : > { %626 = vpow2.f32 %v261_v49  ;;  %v327_v21 = vrot.slane %v326_v3, 4 }
  0x30   : > { %628 = vpow2.f32 %v263_v50  ;;  %v322_v46 = vrot.slane %v321_v42, 1 }
  0x31   : > { %630 = vpow2.f32 %v265_v51  ;;  %v328_v27 = vadd.f32 %v327_v21, %v326_v3 }
  0x32   : > { %632 = vpow2.f32 %v267_v52  ;;  %v323_v48 = vadd.f32 %v322_v46, %v321_v42 }
  0x33   : > { %634 = vpow2.f32 %v269_v54  ;;  %v329_v38 = vrot.slane %v328_v27, 2 }
  0x34   : > { %636 = vpow2.f32 %v271_v56  ;;  %v333_v50 = vsub.f32 %v323_v48, %v813_v36 }
  0x35   : > { %v330_v44 = vadd.f32 %v329_v38, %v328_v27 }
  0x37   : > { %v331_v47 = vrot.slane %v330_v44, 1 }
  0x39   : > { %v627_v12 = vpop.eup %626  ;;  %v332_v49 = vadd.f32 %v331_v47, %v330_v44 }
  0x3a   : > { %v629_v6 = vpop.eup %628 }
  0x3b   : > { %v631_v14 = vpop.eup %630  ;;  %v334_v52 = vsub.f32 %v332_v49, %v815_v37 }
  0x3c   : > { %v633_v15 = vpop.eup %632  ;;  %v273_v7 = vadd.f32 %v631_v14, %v627_v12  ;;  %v439_v12 = vld [vmem:[#allocation3] sm:$0x3] (%p406_p6) }
  0x3d   : > { %v635_v16 = vpop.eup %634  ;;  %v282_v4 = vadd.f32 %v633_v15, %v629_v6  ;;  %v444_v14 = vrot.slane (%p406_p6), %v439_v12, %v807_v30 }
  0x3e   : > { %v637_v17 = vpop.eup %636  ;;  %v274_v18 = vsel %vm236_vm1, %v635_v16, 0.0 }
  0x3f   : > { %v275_v5 = vadd.f32 %v274_v18, %v273_v7  ;;  %v283_v20 = vsel %vm236_vm1, %v637_v17, 0.0  ;;  %v451_v15 = vsel (%p406_p6), %vm423_vm12, %v444_v14, 0.0 }
  0x40   : > { %v284_v22 = vadd.f32 %v283_v20, %v282_v4 }
  0x41   : > { %v276_v23 = vrot.slane %v275_v5, 4 }
  0x42   : > { %v285_v24 = vrot.slane %v284_v22, 4 }
  0x43   : > { %v277_v26 = vadd.f32 %v276_v23, %v275_v5 }
  0x44   : > { %v286_v28 = vadd.f32 %v285_v24, %v284_v22 }
  0x45   : > { %v278_v31 = vrot.slane %v277_v26, 2 }
  0x46   : > { %v287_v32 = vrot.slane %v286_v28, 2 }
  0x47   : > { %v279_v34 = vadd.f32 %v278_v31, %v277_v26 }
  0x48   : > { %v288_v39 = vadd.f32 %v287_v32, %v286_v28 }
  0x49   : > { %v280_v40 = vrot.slane %v279_v34, 1 }
  0x4a   : > { %v289_v41 = vrot.slane %v288_v39, 1 }
  0x4b   : > { %v281_v43 = vadd.f32 %v280_v40, %v279_v34 }
  0x4c   : > { %v290_v45 = vadd.f32 %v289_v41, %v288_v39 }
  0x4d   : > { %638 = vlog2.f32 %v281_v43 }
  0x4e   : > { %640 = vlog2.f32 %v290_v45 }
  0x57   : > { %v639_v51 = vpop.eup %638 }
  0x58   : > { %v641_v54 = vpop.eup %640  ;;  %v336_v55 = vmul.f32 0.6931472, %v639_v51 }
  0x59   : > { %v338_v56 = vmul.f32 0.6931472, %v641_v54 }
  0x5a   : > { %v339_v58 = vsub.f32 %v333_v50, %v336_v55 }
  0x5b   : > { %v340_v59 = vsub.f32 %v334_v52, %v338_v56 }
  0x5c   : > { %v341_v60 = vmax.f32 %v339_v58, -16.118095 }
  0x5d   : > { %v342_v61 = vmax.f32 %v340_v59, -16.118095 }
  0x5e   : > { %v343_v62 = vmin.f32 %v341_v60, -1.0000001e-07 }
  0x5f   : > { %v344_v63 = vmin.f32 %v342_v61, -1.0000001e-07 }
  0x60   : > { %v345_v0 = vsub.f32 0.0, %v343_v62 }
  0x61   : > { %v346_v1 = vsub.f32 0.0, %v344_v63 }
  0x63   : > { %v379_v8 = vcombine.low %v345_v0, %v346_v1 }
  0x65   : > { %v386_v9 = vrot.slane %v379_v8, %v805_v29 }
  0x66   : > { %410 = sbr.rel (!%p406_p6) target bundleno = 331 (0x14b), region = 36 }
  0x67   : > { %v393_v36 = vrot.slane %v386_v9, %v805_v29  ;;  %v448_v29 = vrot.slane (%p406_p6), %v439_v12, %v811_v35 }
  0x69   : > { %v395_v37 = vsel %vm837_vm8, %v393_v36, 0.0  ;;  %v452_v7 = vsel (%p406_p6), %vm423_vm12, %v448_v29, 0.0 }
  0x6a   : > { %v396_v11 = vadd.f32 %v395_v37, %v376_v10  ;;  %v453_v16 = vadd.f32 (%p406_p6), %v452_v7, %v451_v15 }
  0x6c   : > { %401 = vst.msk [vmem:[#allocation2] sm:$0x3] %vm832_vm3, %v396_v11 }
  0x73   : > { %v411_v2 = vld [vmem:[#allocation2] sm:$0x3] }
  0x74   : > { %v416_v6 = vrot.slane %v411_v2, %v807_v30  ;;  %v420_v13 = vrot.slane %v411_v2, %v811_v35 }
  0x76   : > { %v424_v57 = vsel %vm423_vm12, %v416_v6, 0.0  ;;  %v425_v3 = vsel %vm423_vm12, %v420_v13, 0.0 }
  0x77   : > { %v426_v53 = vadd.f32 %v425_v3, %v424_v57 }
  0x79   : > { %427 = vadd.xlane.f32.xlu0 %v426_v53 }
  0x7d   : > { %454 = vadd.xlane.f32.xlu0 %v453_v16 }
 0x106   : > { %v428_v4 = vpop.xlane.xlu0 %427 }
 0x107   : > { %v429_v17 = vrot.slane %v428_v4, 4 }
 0x109   : > { %v430_v18 = vadd.f32 %v429_v17, %v428_v4 }
 0x10a   : > { %v455_v19 = vpop.xlane.xlu0 %454 }
 0x10b   : > { %v431_v5 = vrot.slane %v430_v18, 2  ;;  %v456_v20 = vrot.slane %v455_v19, 4 }
 0x10d   : > { %v457_v21 = vadd.f32 %v456_v20, %v455_v19  ;;  %v432_v22 = vadd.f32 %v431_v5, %v430_v18 }
 0x10f   : > { %v458_v23 = vrot.slane %v457_v21, 2  ;;  %v433_v30 = vrot.slane %v432_v22, 1 }
 0x111   : > { %v459_v24 = vadd.f32 %v458_v23, %v457_v21  ;;  %v434_v35 = vadd.f32 %v433_v30, %v432_v22 }
 0x113   : > { %580 = vpush %v434_v35  ;;  %v460_v25 = vrot.slane %v459_v24, 1 }
 0x115   : > { %v461_v26 = vadd.f32 %v460_v25, %v459_v24 }
 0x117   : > { %582 = vpush %v461_v26 }
 0x144   : > { %s581_s26 = spop %580 }
 0x145   : > { %v436_v27 = vstv %s581_s26 }
 0x146   : > { %438 = vst.msk [vmem:[#allocation4] sm:$0x1] %vm437_vm13, %v436_v27 }
 0x148   : > { %s583_s27 = spop %582 }
 0x149   : > { %v463_v28 = vstv %s583_s27 }
 0x14a   : > { %464 = vst.msk [vmem:[#allocation6] sm:$0x1] %vm437_vm13, %v463_v28 }
 0x14b PF: > { %p872_p7 = scmp.eq.s32.totalorder %s563_s15, 1  ;;  %s730_s29 = smov [#allocation4]  }
 0x14c   : > { %s472_s30 = sshll.u32 %s730_s29, 4  ;;  %s731_s4 = smov [#allocation6]   ;;  %s473_s30 = int_to_ptr.vmem [resolvable:$true] %s472_s30 }
 0x14d   : > { %s483_s5 = sshll.u32 %s731_s4, 4  ;;  %s642_s6 = scalar_lea.vmem %s473_s30, 16  ;;  %s876_s5 = int_to_ptr.vmem [resolvable:$true] %s483_s5 }
 0x14e   : > { %p643_p8 = scmp.ne.s32.totalorder %s473_s30, %s642_s6  ;;  %s648_s7 = scalar_lea.vmem %s473_s30, 32 }
 0x14f   : > { %p649_p11 = scmp.lt.s32.totalorder %s473_s30, %s473_s30  ;;  %p650_p12 = scmp.lt.s32.totalorder %s648_s7, %s642_s6 }
 0x150   : > { %p644_p9 = pnand %p643_p8, %p872_p7 }
 0x151   : > { %p651_p13 = por %p650_p12, %p649_p11 }
 0x152   : > { %p645_p10 = pneg %p644_p9 }
 0x154   : > { %p652_p0 = pnand %p651_p13, %p645_p10 }
 0x156   : > { %655 = shalt.err (!%p652_p0)
}
 0x157   : > { %s656_s10 = scalar_lea.hbm %s939_s2, 16 }
 0x158   : > { %p657_p1 = scmp.ne.s32.totalorder %s939_s2, %s656_s10  ;;  %p662_p4 = scmp.lt.u32.totalorder %s656_s10, %s939_s2 }
 0x15a   : > { %p658_p2 = pnand %p657_p1, %p872_p7 }
 0x15c   : > { %p659_p3 = pneg %p658_p2 }
 0x15e   : > { %p664_p5 = pnand %p662_p4, %p659_p3 }
 0x160   : > { %667 = shalt.err (!%p664_p5)
}
 0x161   : > { %585 = dma.vmem_to_hbm [thread:$0]  (%p872_p7), %s473_s30, 16, %s939_s2, [#allocation5]  }
 0x162   : > { %s668_s20 = scalar_lea.vmem %s876_s5, 16  ;;  %s674_s21 = scalar_lea.vmem %s876_s5, 32 }
 0x163   : > { %p669_p6 = scmp.ne.s32.totalorder %s876_s5, %s668_s20  ;;  %p675_p10 = scmp.lt.s32.totalorder %s876_s5, %s876_s5 }
 0x164   : > { %p676_p11 = scmp.lt.s32.totalorder %s674_s21, %s668_s20 }
 0x165   : > { %p670_p8 = pnand %p669_p6, %p872_p7 }
 0x166   : > { %p677_p12 = por %p676_p11, %p675_p10 }
 0x167   : > { %p671_p9 = pneg %p670_p8 }
 0x169   : > { %p678_p13 = pnand %p677_p12, %p671_p9 }
 0x16b   : > { %681 = shalt.err (!%p678_p13)
}
 0x16c   : > { %s682_s24 = scalar_lea.hbm %s940_s3, 16 }
 0x16d   : > { %p683_p0 = scmp.ne.s32.totalorder %s940_s3, %s682_s24  ;;  %p688_p3 = scmp.lt.u32.totalorder %s682_s24, %s940_s3 }
 0x16f   : > { %p684_p1 = pnand %p683_p0, %p872_p7 }
 0x171   : > { %p685_p2 = pneg %p684_p1 }
 0x173   : > { %p690_p4 = pnand %p688_p3, %p685_p2 }
 0x175   : > { %693 = shalt.err (!%p690_p4)
}
 0x176   : > { %587 = dma.vmem_to_hbm [thread:$0]  (%p872_p7), %s876_s5, 16, %s940_s3, [#allocation7]  }
 0x177   : > { %707 = dma.done.wait (%p872_p7), [#allocation5], 16  }
 0x178   : > { %709 = vsyncadd (%p872_p7), [#allocation5], 4294967280 }
 0x179   : > { %711 = dma.done.wait (%p872_p7), [#allocation7], 16  }
 0x17a   : > { %713 = vsyncadd (%p872_p7), [#allocation7], 4294967280 }
 0x17b PF: > { %s16_s14 = sadd.s32 1, %s724_s14   ;;  %s946_s12 = smov %s720_s13 }
 0x17c   : > { %p13_p5 = scmp.ge.s32.totalorder %s16_s14, 4   ;;  %s947_s13 = smov %s949_s16 }
 0x17e   :  { %15 = sbr.rel (!%p13_p5) target bundleno = 3 (0x3), region = 74 }
 0x185   :  { %500 = vsyncpa [#allocation5], 1 }
 0x186   :  { %502 = vsyncpa [#allocation5 + $0x1], 1 }
 0x187   :  { %503 = vsyncpa [#allocation7], 1 }

</bundles_post_ra>
